<compile_context>
chip_gen: v7x
topology: tpu7x:2x2x1
jax: 0.10.0
libtpu: 0.0.40
codegen_flags: <defaults>
</compile_context>

<pallas_src>
import functools

import jax
import jax.numpy as jnp
from jax import lax
from jax.experimental import pallas as pl
from jax.experimental.pallas import tpu as pltpu

EPS = 1e-5

_MAX_LANES = 8192                 # lane tile for the streamed path (multiple of 128)
_VMEM_LIMIT = 40 * 1024 * 1024    # well under v7x's 64 MiB physical; big headroom on v5e/v6e
_FUSED_BYTES = 4 * 1024 * 1024    # f32 working-set threshold for the VMEM-resident path


# --------------------------------------------------------------------------- #
# Fused single-pass kernel: whole tensor resident in VMEM (1 read + 1 write)
# --------------------------------------------------------------------------- #
def _fused_kernel(x_ref, o_ref, *, inv_count):
    x = x_ref[...]                               # (N, C, HW)
    if x.dtype != jnp.float32:
        x = x.astype(jnp.float32)
    s2d = jnp.sum(x, axis=0)                     # (C, HW): VPU adds over batch planes
    sq2d = jnp.sum(x * x, axis=0)
    mean = jnp.sum(s2d, axis=-1, keepdims=True) * inv_count        # (C, 1)  single XLU reduce
    ex2 = jnp.sum(sq2d, axis=-1, keepdims=True) * inv_count
    var = jnp.maximum(ex2 - mean * mean, 0.0)                      # biased variance
    inv = lax.rsqrt(var + EPS)
    o_ref[...] = ((x - mean[None]) * inv[None]).astype(o_ref.dtype)


# --------------------------------------------------------------------------- #
# Streamed path, pass 1: per-channel partial sums (one row per core split)
# --------------------------------------------------------------------------- #
def _stats_kernel(x_ref, psum_ref, psq_ref, sum_acc, sq_acc, *,
                  hw, hw_blk, blocks_per_split, need_mask):
    split = pl.program_id(0)
    ni = pl.program_id(1)
    hi = pl.program_id(2)

    @pl.when(jnp.logical_and(ni == 0, hi == 0))
    def _init():
        sum_acc[...] = jnp.zeros_like(sum_acc)
        sq_acc[...] = jnp.zeros_like(sq_acc)

    x = x_ref[0]                                 # (C, hw_blk)
    if x.dtype != jnp.float32:
        x = x.astype(jnp.float32)
    if need_mask:
        # Mask lanes past the real extent (tail block or fully-clamped block)
        # so cdiv grids / odd splits never pollute the accumulators.
        start = (split * blocks_per_split + hi) * hw_blk
        lane = lax.broadcasted_iota(jnp.int32, x.shape, 1)
        x = jnp.where(start + lane < hw, x, 0.0)

    # Lane-wise accumulation: pure VPU adds every block; XLU touched once below.
    sum_acc[...] += x
    sq_acc[...] += x * x

    last = jnp.logical_and(ni == pl.num_programs(1) - 1,
                           hi == pl.num_programs(2) - 1)

    @pl.when(last)
    def _finalize():
        psum_ref[0] = jnp.sum(sum_acc[...], axis=1, keepdims=True)
        psq_ref[0] = jnp.sum(sq_acc[...], axis=1, keepdims=True)


# --------------------------------------------------------------------------- #
# Streamed path, pass 2: normalize (fully parallel; shards across v7x's 2 TCs)
# --------------------------------------------------------------------------- #
def _norm_kernel(x_ref, mean_ref, inv_ref, o_ref):
    x = x_ref[0]                                 # (C, hw_blk)
    if x.dtype != jnp.float32:
        x = x.astype(jnp.float32)
    o_ref[0] = ((x - mean_ref[...]) * inv_ref[...]).astype(o_ref.dtype)


def batchnorm2d(x):
    """x: (N, C, H, W) -> (N, C, H, W); training-mode BatchNorm2d, affine=False."""
    n, c, h, w = x.shape
    hw = h * w
    x3 = x.reshape(n, c, hw)                     # free reshape, no transpose
    inv_count = 1.0 / float(n * hw)

    # ---- small/medium tensors: fully fused, VMEM-resident ------------------
    if n * c * hw * 4 <= _FUSED_BYTES:
        out3 = pl.pallas_call(
            functools.partial(_fused_kernel, inv_count=inv_count),
            out_shape=jax.ShapeDtypeStruct((n, c, hw), x.dtype),
            compiler_params=pltpu.CompilerParams(vmem_limit_bytes=_VMEM_LIMIT),
        )(x3)
        return out3.reshape(n, c, h, w)

    # ---- large tensors: two streamed, pipelined passes ----------------------
    hw_blk = hw if hw <= _MAX_LANES else _MAX_LANES       # full extent or 8192 (128-aligned)
    hw_grid = pl.cdiv(hw, hw_blk)
    num_splits = 2 if hw_grid >= 2 else 1                 # dual-TC stats on v7x
    blocks_per_split = pl.cdiv(hw_grid, num_splits)
    need_mask = (num_splits * blocks_per_split * hw_blk) != hw

    def x_stats_map(split, ni, hi):
        blk = split * blocks_per_split + hi
        return (ni, 0, jnp.minimum(blk, hw_grid - 1))     # clamp; kernel masks clamped blocks

    # pass 1: per-channel partial sum / sum-of-squares, one row per split
    psum, psq = pl.pallas_call(
        functools.partial(_stats_kernel, hw=hw, hw_blk=hw_blk,
                          blocks_per_split=blocks_per_split, need_mask=need_mask),
        out_shape=(jax.ShapeDtypeStruct((num_splits, c, 1), jnp.float32),
                   jax.ShapeDtypeStruct((num_splits, c, 1), jnp.float32)),
        grid_spec=pltpu.PrefetchScalarGridSpec(
            num_scalar_prefetch=0,
            grid=(num_splits, n, blocks_per_split),
            in_specs=[pl.BlockSpec((1, c, hw_blk), x_stats_map)],
            out_specs=(pl.BlockSpec((1, c, 1), lambda s, ni, hi: (s, 0, 0)),
                       pl.BlockSpec((1, c, 1), lambda s, ni, hi: (s, 0, 0))),
            scratch_shapes=[pltpu.VMEM((c, hw_blk), jnp.float32),
                            pltpu.VMEM((c, hw_blk), jnp.float32)]),
        compiler_params=pltpu.CompilerParams(
            dimension_semantics=("parallel", "arbitrary", "arbitrary"),
            vmem_limit_bytes=_VMEM_LIMIT),
    )(x3)

    # tiny epilogue on (C,1): combine per-core partials, finish mean / inv_std
    s = jnp.sum(psum, axis=0)
    ss = jnp.sum(psq, axis=0)
    mean = s * inv_count
    var = jnp.maximum(ss * inv_count - mean * mean, 0.0)
    inv = lax.rsqrt(var + EPS)

    # pass 2: normalize, fully parallel
    out3 = pl.pallas_call(
        _norm_kernel,
        out_shape=jax.ShapeDtypeStruct((n, c, hw), x.dtype),
        grid_spec=pltpu.PrefetchScalarGridSpec(
            num_scalar_prefetch=0,
            grid=(n, hw_grid),
            in_specs=[pl.BlockSpec((1, c, hw_blk), lambda ni, hi: (ni, 0, hi)),
                      pl.BlockSpec((c, 1), lambda ni, hi: (0, 0)),
                      pl.BlockSpec((c, 1), lambda ni, hi: (0, 0))],
            out_specs=pl.BlockSpec((1, c, hw_blk), lambda ni, hi: (ni, 0, hi))),
        compiler_params=pltpu.CompilerParams(
            dimension_semantics=("parallel", "parallel"),
            vmem_limit_bytes=_VMEM_LIMIT),
    )(x3, mean, inv)

    return out3.reshape(n, c, h, w)


def _reference(x):
    mean = jnp.mean(x, axis=(0, 2, 3), keepdims=True)
    var = jnp.var(x, axis=(0, 2, 3), keepdims=True)   # biased, matches training BN
    return (x - mean) / jnp.sqrt(var + EPS)


if __name__ == "__main__":
    key = jax.random.PRNGKey(0)
    # BatchNorm2d(num_features=100) -> channel dim must be 100; small batch/spatial.
    x = jax.random.normal(key, (2, 100, 8, 8), dtype=jnp.float32)

    bn = jax.jit(batchnorm2d)
    out = jax.block_until_ready(bn(x))

    ref = _reference(x)
    assert out.shape == x.shape
    assert jnp.allclose(out, ref, atol=1e-4, rtol=1e-4)
    print("KERNEL_OK")
</pallas_src>

<mosaic_0001>
module attributes {stable_mosaic.version = 11 : i64} {
  func.func @_fused_kernel(%arg0: memref<2x100x64xf32, #tpu.memory_space<vmem>>, %arg1: memref<2x100x64xf32, #tpu.memory_space<vmem>>) attributes {dimension_semantics = [], scalar_prefetch = 0 : i64, scratch_operands = 0 : i64, tpu.core_type = #tpu.core_type<tc>} {
    %c0 = arith.constant 0 : index
    %c0_0 = arith.constant 0 : index
    %c0_1 = arith.constant 0 : index
    %0 = vector.load %arg0[%c0, %c0_0, %c0_1] : memref<2x100x64xf32, #tpu.memory_space<vmem>>, vector<2x100x64xf32>
    %cst = arith.constant dense<0.000000e+00> : vector<100x64xf32>
    %1 = vector.multi_reduction <add>, %0, %cst [0] : vector<2x100x64xf32> to vector<100x64xf32>
    %2 = arith.mulf %0, %0 : vector<2x100x64xf32>
    %cst_2 = arith.constant dense<0.000000e+00> : vector<100x64xf32>
    %3 = vector.multi_reduction <add>, %2, %cst_2 [0] : vector<2x100x64xf32> to vector<100x64xf32>
    %cst_3 = arith.constant dense<0.000000e+00> : vector<100xf32>
    %4 = vector.multi_reduction <add>, %1, %cst_3 [1] : vector<100x64xf32> to vector<100xf32>
    %5 = vector.shape_cast %4 : vector<100xf32> to vector<100x1xf32>
    %cst_4 = arith.constant 7.812500e-03 : f32
    %6 = vector.broadcast %cst_4 : f32 to vector<100x1xf32>
    %7 = arith.mulf %5, %6 : vector<100x1xf32>
    %cst_5 = arith.constant dense<0.000000e+00> : vector<100xf32>
    %8 = vector.multi_reduction <add>, %3, %cst_5 [1] : vector<100x64xf32> to vector<100xf32>
    %9 = vector.shape_cast %8 : vector<100xf32> to vector<100x1xf32>
    %cst_6 = arith.constant 7.812500e-03 : f32
    %10 = vector.broadcast %cst_6 : f32 to vector<100x1xf32>
    %11 = arith.mulf %9, %10 : vector<100x1xf32>
    %12 = arith.mulf %7, %7 : vector<100x1xf32>
    %13 = arith.subf %11, %12 : vector<100x1xf32>
    %cst_7 = arith.constant 0.000000e+00 : f32
    %14 = vector.broadcast %cst_7 : f32 to vector<100x1xf32>
    %15 = arith.maximumf %13, %14 : vector<100x1xf32>
    %cst_8 = arith.constant 9.99999974E-6 : f32
    %16 = vector.broadcast %cst_8 : f32 to vector<100x1xf32>
    %17 = arith.addf %15, %16 : vector<100x1xf32>
    %18 = math.rsqrt %17 : vector<100x1xf32>
    %19 = vector.shape_cast %7 : vector<100x1xf32> to vector<1x100x1xf32>
    %20 = vector.broadcast %19 : vector<1x100x1xf32> to vector<2x100x64xf32>
    %21 = arith.subf %0, %20 : vector<2x100x64xf32>
    %22 = vector.shape_cast %18 : vector<100x1xf32> to vector<1x100x1xf32>
    %23 = vector.broadcast %22 : vector<1x100x1xf32> to vector<2x100x64xf32>
    %24 = arith.mulf %21, %23 : vector<2x100x64xf32>
    %c0_9 = arith.constant 0 : index
    %c0_10 = arith.constant 0 : index
    %c0_11 = arith.constant 0 : index
    %25 = vector.load %arg1[%c0_9, %c0_10, %c0_11] : memref<2x100x64xf32, #tpu.memory_space<vmem>>, vector<2x100x64xf32>
    tpu.vector_store %arg1[%c0_9, %c0_10, %c0_11], %24 {strides = array<i32>} : memref<2x100x64xf32, #tpu.memory_space<vmem>>, vector<2x100x64xf32>,
    return
  }
}

</mosaic_0001>

<bundles_post_ra>
// kernel: batchnorm2d.1
= control target key start
LH: loop header
LB: loop body
LE: loop exit
PB: predicated region body
PF: predicated region fallthrough
CT: control target
= control target key end

     0   :  { %vm34_vm0 = vcmask 523264   ;;  %vm71_vm1 = vcmask 519168   ;;  %s942_s0 = inlined_call_operand.vmem [shape: f32[2,100,64], index: 0, kind: input, shape index: {}]   ;;  %s943_s1 = inlined_call_operand.vmem [shape: f32[2,100,64], index: 1, kind: output, shape index: {}]  }
   0x1   :  { %v430_v0 = vld [vmem:[%s942_s0 + $0x10] sm:$0xff]  ;;  %v435_v1 = vld [vmem:[%s942_s0 + $0x78] sm:$0xff]  ;;  %v440_v2 = vld [vmem:[%s942_s0] sm:$0xff] }
   0x2   :  { %v41_v3 = vsel %vm34_vm0, %v430_v0, 0.0  ;;  %v42_v4 = vsel %vm34_vm0, %v435_v1, 0.0  ;;  %v449_v5 = vld [vmem:[%s942_s0 + $0x68] sm:$0xff]  ;;  %v35_v6 = vsel %vm34_vm0, %v440_v2, 0.0  ;;  %v456_v7 = vld [vmem:[%s942_s0 + $0x18] sm:$0xff]  ;;  %v461_v8 = vld [vmem:[%s942_s0 + $0x80] sm:$0xff]  ;;  %v75_v61 = vmul.f32 %v440_v2, %v440_v2 }
   0x3   :  { %v43_v9 = vadd.f32 %v42_v4, %v41_v3  ;;  %v36_v10 = vsel %vm34_vm0, %v449_v5, 0.0  ;;  %v44_v11 = vsel %vm34_vm0, %v456_v7, 0.0  ;;  %v45_v12 = vsel %vm34_vm0, %v461_v8, 0.0  ;;  %v472_v13 = vld [vmem:[%s942_s0 + $0x8] sm:$0xff]  ;;  %v477_v14 = vld [vmem:[%s942_s0 + $0x70] sm:$0xff]  ;;  %v496_v21 = vld [vmem:[%s942_s0 + $0x20] sm:$0xff] }
   0x4   :  { %v482_v15 = vld [vmem:[%s942_s0 + $0x28] sm:$0xff]  ;;  %v37_v16 = vadd.f32 %v36_v10, %v35_v6  ;;  %v46_v17 = vadd.f32 %v45_v12, %v44_v11  ;;  %v38_v18 = vsel %vm34_vm0, %v472_v13, 0.0  ;;  %v39_v19 = vsel %vm34_vm0, %v477_v14, 0.0  ;;  %v491_v20 = vld [vmem:[%s942_s0 + $0x90] sm:$0xff]  ;;  %v511_v27 = vld [vmem:[%s942_s0 + $0x38] sm:$0xff] }
   0x5   :  { %v501_v22 = vld [vmem:[%s942_s0 + $0x88] sm:$0xff]  ;;  %v146_v23 = vsel %vm34_vm0, %v43_v9, 0.0  ;;  %v40_v24 = vadd.f32 %v39_v19, %v38_v18  ;;  %v50_v25 = vsel %vm34_vm0, %v482_v15, 0.0  ;;  %v51_v26 = vsel %vm34_vm0, %v491_v20, 0.0  ;;  %v516_v28 = vld [vmem:[%s942_s0 + $0xa0] sm:$0xff]  ;;  %v524_v31 = vld [vmem:[%s942_s0 + $0x30] sm:$0xff] }
   0x6   :  { %147 = vadd.xlane.f32.xlu1 %v146_v23  ;;  %v140_v29 = vsel %vm34_vm0, %v37_v16, 0.0  ;;  %v47_v30 = vsel %vm34_vm0, %v496_v21, 0.0  ;;  %v529_v32 = vld [vmem:[%s942_s0 + $0x98] sm:$0xff]  ;;  %v149_v33 = vsel %vm34_vm0, %v46_v17, 0.0  ;;  %v52_v34 = vadd.f32 %v51_v26, %v50_v25  ;;  %v537_v36 = vld [vmem:[%s942_s0 + $0x48] sm:$0xff]  ;;  %v542_v37 = vld [vmem:[%s942_s0 + $0xb0] sm:$0xff] }
   0x7   :  { %141 = vadd.xlane.f32.xlu0 %v140_v29  ;;  %v48_v35 = vsel %vm34_vm0, %v501_v22, 0.0  ;;  %v143_v38 = vsel %vm34_vm0, %v40_v24, 0.0  ;;  %v56_v40 = vsel %vm34_vm0, %v511_v27, 0.0  ;;  %v57_v41 = vsel %vm34_vm0, %v516_v28, 0.0  ;;  %v560_v46 = vld [vmem:[%s942_s0 + $0x40] sm:$0xff]  ;;  %v565_v47 = vld [vmem:[%s942_s0 + $0xa8] sm:$0xff] }
   0x8   :  { %v49_v39 = vadd.f32 %v48_v35, %v47_v30  ;;  %v53_v42 = vsel %vm34_vm0, %v524_v31, 0.0  ;;  %v54_v43 = vsel %vm34_vm0, %v529_v32, 0.0  ;;  %v62_v44 = vsel %vm34_vm0, %v537_v36, 0.0  ;;  %v571_v50 = vld [vmem:[%s942_s0 + $0x58] sm:$0xff]  ;;  %v576_v51 = vld [vmem:[%s942_s0 + $0xc0] sm:$0xff]  ;;  %v590_v59 = vld [vmem:[%s942_s0 + $0x50] sm:$0xff] }
   0x9   :  { %v63_v45 = vsel %vm34_vm0, %v542_v37, 0.0  ;;  %v155_v48 = vsel %vm34_vm0, %v52_v34, 0.0  ;;  %v58_v49 = vadd.f32 %v57_v41, %v56_v40  ;;  %v55_v53 = vadd.f32 %v54_v43, %v53_v42  ;;  %v595_v60 = vld [vmem:[%s942_s0 + $0xb8] sm:$0xff]  ;;  %v605_v3 = vld [vmem:[%s942_s0 + $0x60] sm:$0xf] }
   0xa   :  { %150 = vadd.xlane.f32.xlu1 %v149_v33  ;;  %v152_v52 = vsel %vm34_vm0, %v49_v39, 0.0  ;;  %v64_v54 = vadd.f32 %v63_v45, %v62_v44  ;;  %v59_v55 = vsel %vm34_vm0, %v560_v46, 0.0  ;;  %v60_v56 = vsel %vm34_vm0, %v565_v47, 0.0  ;;  %v611_v9 = vld [vmem:[%s942_s0 + $0xc8] sm:$0xf] }
   0xb   :  { %144 = vadd.xlane.f32.xlu0 %v143_v38  ;;  %v68_v57 = vsel %vm34_vm0, %v571_v50, 0.0  ;;  %v69_v58 = vsel %vm34_vm0, %v576_v51, 0.0  ;;  %v161_v62 = vsel %vm34_vm0, %v58_v49, 0.0  ;;  %v88_v63 = vmul.f32 %v449_v5, %v449_v5 }
   0xc   :  { %v158_v4 = vsel %vm34_vm0, %v55_v53, 0.0  ;;  %v61_v6 = vadd.f32 %v60_v56, %v59_v55  ;;  %v167_v10 = vsel %vm34_vm0, %v64_v54, 0.0  ;;  %v70_v11 = vadd.f32 %v69_v58, %v68_v57 }
   0xd   :  { %v65_v12 = vsel %vm34_vm0, %v590_v59, 0.0  ;;  %v66_v16 = vsel %vm34_vm0, %v595_v60, 0.0  ;;  %v101_v17 = vsel %vm34_vm0, %v75_v61, 0.0  ;;  %v72_v18 = vsel %vm71_vm1, %v605_v3, 0.0 }
   0xe   :  { %156 = vadd.xlane.f32.xlu1 %v155_v48  ;;  %v77_v19 = vmul.f32 %v430_v0, %v430_v0  ;;  %v90_v23 = vmul.f32 %v435_v1, %v435_v1  ;;  %v102_v24 = vsel %vm34_vm0, %v88_v63, 0.0  ;;  %v73_v25 = vsel %vm71_vm1, %v611_v9, 0.0 }
   0xf   :  { %153 = vadd.xlane.f32.xlu0 %v152_v52  ;;  %v76_v26 = vmul.f32 %v472_v13, %v472_v13  ;;  %v89_v29 = vmul.f32 %v477_v14, %v477_v14  ;;  %v164_v30 = vsel %vm34_vm0, %v61_v6, 0.0  ;;  %v67_v33 = vadd.f32 %v66_v16, %v65_v12 }
  0x10   :  { %v173_v34 = vsel %vm34_vm0, %v70_v11, 0.0  ;;  %v103_v35 = vadd.f32 %v102_v24, %v101_v17  ;;  %v74_v38 = vadd.f32 %v73_v25, %v72_v18  ;;  %v107_v39 = vsel %vm34_vm0, %v77_v19, 0.0 }
  0x11   :  { %v108_v40 = vsel %vm34_vm0, %v90_v23, 0.0  ;;  %v104_v41 = vsel %vm34_vm0, %v76_v26, 0.0  ;;  %v105_v42 = vsel %vm34_vm0, %v89_v29, 0.0  ;;  %v79_v43 = vmul.f32 %v496_v21, %v496_v21 }
  0x12   :  { %162 = vadd.xlane.f32.xlu1 %v161_v62  ;;  %v92_v44 = vmul.f32 %v501_v22, %v501_v22  ;;  %v170_v45 = vsel %vm34_vm0, %v67_v33, 0.0  ;;  %v78_v48 = vmul.f32 %v456_v7, %v456_v7  ;;  %v91_v49 = vmul.f32 %v461_v8, %v461_v8 }
  0x13   :  { %159 = vadd.xlane.f32.xlu0 %v158_v4  ;;  %v176_v52 = vsel %vm71_vm1, %v74_v38, 0.0  ;;  %v109_v53 = vadd.f32 %v108_v40, %v107_v39  ;;  %v106_v54 = vadd.f32 %v105_v42, %v104_v41  ;;  %v81_v55 = vmul.f32 %v524_v31, %v524_v31 }
  0x14   :  { %v192_v56 = vsel %vm34_vm0, %v103_v35, 0.0  ;;  %v113_v57 = vsel %vm34_vm0, %v79_v43, 0.0  ;;  %v114_v58 = vsel %vm34_vm0, %v92_v44, 0.0  ;;  %v94_v61 = vmul.f32 %v529_v32, %v529_v32 }
  0x15   :  { %v110_v62 = vsel %vm34_vm0, %v78_v48, 0.0  ;;  %v111_v63 = vsel %vm34_vm0, %v91_v49, 0.0  ;;  %v80_v4 = vmul.f32 %v482_v15, %v482_v15  ;;  %v93_v6 = vmul.f32 %v491_v20, %v491_v20 }
  0x16   :  { %168 = vadd.xlane.f32.xlu1 %v167_v10  ;;  %v198_v10 = vsel %vm34_vm0, %v109_v53, 0.0  ;;  %v195_v11 = vsel %vm34_vm0, %v106_v54, 0.0  ;;  %v115_v12 = vadd.f32 %v114_v58, %v113_v57  ;;  %v119_v16 = vsel %vm34_vm0, %v81_v55, 0.0 }
  0x17   :  { %165 = vadd.xlane.f32.xlu0 %v164_v30  ;;  %v112_v17 = vadd.f32 %v111_v63, %v110_v62  ;;  %v120_v18 = vsel %vm34_vm0, %v94_v61, 0.0  ;;  %v83_v19 = vmul.f32 %v560_v46, %v560_v46  ;;  %v96_v23 = vmul.f32 %v565_v47, %v565_v47 }
  0x18   :  { %v116_v24 = vsel %vm34_vm0, %v80_v4, 0.0  ;;  %v117_v25 = vsel %vm34_vm0, %v93_v6, 0.0  ;;  %v82_v26 = vmul.f32 %v511_v27, %v511_v27  ;;  %v95_v29 = vmul.f32 %v516_v28, %v516_v28 }
  0x19   :  { %v204_v30 = vsel %vm34_vm0, %v115_v12, 0.0  ;;  %v121_v33 = vadd.f32 %v120_v18, %v119_v16  ;;  %v118_v35 = vadd.f32 %v117_v25, %v116_v24  ;;  %v125_v38 = vsel %vm34_vm0, %v83_v19, 0.0 }
  0x1a   :  { %174 = vadd.xlane.f32.xlu1 %v173_v34  ;;  %v201_v34 = vsel %vm34_vm0, %v112_v17, 0.0  ;;  %v126_v39 = vsel %vm34_vm0, %v96_v23, 0.0  ;;  %v122_v40 = vsel %vm34_vm0, %v82_v26, 0.0  ;;  %v123_v41 = vsel %vm34_vm0, %v95_v29, 0.0 }
  0x1b   :  { %171 = vadd.xlane.f32.xlu0 %v170_v45  ;;  %v85_v42 = vmul.f32 %v590_v59, %v590_v59  ;;  %v98_v43 = vmul.f32 %v595_v60, %v595_v60  ;;  %v84_v44 = vmul.f32 %v537_v36, %v537_v36  ;;  %v97_v45 = vmul.f32 %v542_v37, %v542_v37 }
  0x1c   :  { %v210_v48 = vsel %vm34_vm0, %v121_v33, 0.0  ;;  %v207_v49 = vsel %vm34_vm0, %v118_v35, 0.0  ;;  %v124_v53 = vadd.f32 %v123_v41, %v122_v40  ;;  %v100_v57 = vmul.f32 %v611_v9, %v611_v9 }
  0x1d   :  { %v131_v54 = vsel %vm34_vm0, %v85_v42, 0.0  ;;  %v132_v55 = vsel %vm34_vm0, %v98_v43, 0.0  ;;  %v128_v58 = vsel %vm34_vm0, %v84_v44, 0.0  ;;  %v129_v61 = vsel %vm34_vm0, %v97_v45, 0.0 }
  0x1e   :  { %193 = vadd.xlane.f32.xlu1 %v192_v56  ;;  %v87_v56 = vmul.f32 %v605_v3, %v605_v3  ;;  %v86_v62 = vmul.f32 %v571_v50, %v571_v50  ;;  %v99_v63 = vmul.f32 %v576_v51, %v576_v51  ;;  %v133_v6 = vadd.f32 %v132_v55, %v131_v54 }
  0x1f   :  { %177 = vadd.xlane.f32.xlu0 %v176_v52  ;;  %v127_v52 = vadd.f32 %v126_v39, %v125_v38  ;;  %v138_v16 = vsel %vm71_vm1, %v100_v57, 0.0 }
  0x20   :  { %v137_v12 = vsel %vm71_vm1, %v87_v56, 0.0  ;;  %v134_v17 = vsel %vm34_vm0, %v86_v62, 0.0  ;;  %v135_v18 = vsel %vm34_vm0, %v99_v63, 0.0  ;;  %v222_v19 = vsel %vm34_vm0, %v133_v6, 0.0 }
  0x21   :  { %v216_v4 = vsel %vm34_vm0, %v127_v52, 0.0  ;;  %v139_v23 = vadd.f32 %v138_v16, %v137_v12  ;;  %v136_v25 = vadd.f32 %v135_v18, %v134_v17 }
  0x22   :  { %199 = vadd.xlane.f32.xlu1 %v198_v10  ;;  %v213_v10 = vsel %vm34_vm0, %v124_v53, 0.0 }
  0x23   :  { %196 = vadd.xlane.f32.xlu0 %v195_v11  ;;  %v130_v11 = vadd.f32 %v129_v61, %v128_v58  ;;  %v228_v26 = vsel %vm71_vm1, %v139_v23, 0.0  ;;  %v225_v29 = vsel %vm34_vm0, %v136_v25, 0.0 }
  0x25   :  { %v219_v24 = vsel %vm34_vm0, %v130_v11, 0.0 }
  0x26   :  { %205 = vadd.xlane.f32.xlu1 %v204_v30 }
  0x27   :  { %202 = vadd.xlane.f32.xlu0 %v201_v34 }
  0x2a   :  { %211 = vadd.xlane.f32.xlu1 %v210_v48 }
  0x2b   :  { %208 = vadd.xlane.f32.xlu0 %v207_v49 }
  0x2e   :  { %217 = vadd.xlane.f32.xlu1 %v216_v4 }
  0x2f   :  { %214 = vadd.xlane.f32.xlu0 %v213_v10 }
  0x32   :  { %223 = vadd.xlane.f32.xlu1 %v222_v19 }
  0x33   :  { %220 = vadd.xlane.f32.xlu0 %v219_v24 }
  0x36   :  { %229 = vadd.xlane.f32.xlu1 %v228_v26 }
  0x37   :  { %226 = vadd.xlane.f32.xlu0 %v225_v29 }
  0x93   :  { %v148_v30 = vpop.xlane.xlu1 %147 }
  0x94   :  { %v142_v33 = vpop.xlane.xlu0 %141  ;;  %v719_v52 = vmul.f32 0.0078125, %v148_v30 }
  0x95   :  { %v717_v45 = vmul.f32 0.0078125, %v142_v33 }
  0x96   :  { %v246_v63 = vmul.f32 %v719_v52, %v719_v52  ;;  %v311_v16 = vsub.f32 %v430_v0, %v719_v52  ;;  %v324_v19 = vsub.f32 %v435_v1, %v719_v52 }
  0x97   :  { %v151_v34 = vpop.xlane.xlu1 %150  ;;  %v244_v54 = vmul.f32 %v717_v45, %v717_v45  ;;  %v309_v23 = vsub.f32 %v440_v2, %v717_v45  ;;  %v322_v2 = vsub.f32 %v449_v5, %v717_v45 }
  0x98   :  { %v145_v35 = vpop.xlane.xlu0 %144  ;;  %v731_v10 = vmul.f32 0.0078125, %v151_v34 }
  0x99   :  { %v725_v56 = vmul.f32 0.0078125, %v145_v35 }
  0x9b   :  { %v157_v38 = vpop.xlane.xlu1 %156  ;;  %v245_v11 = vmul.f32 %v725_v56, %v725_v56 }
  0x9c   :  { %v154_v39 = vpop.xlane.xlu0 %153  ;;  %v745_v35 = vmul.f32 0.0078125, %v157_v38 }
  0x9d   :  { %v727_v58 = vmul.f32 0.0078125, %v154_v39 }
  0x9e   :  { %v249_v45 = vmul.f32 %v745_v35, %v745_v35 }
  0x9f   :  { %v163_v40 = vpop.xlane.xlu1 %162  ;;  %v248_v26 = vmul.f32 %v727_v58, %v727_v58 }
  0xa0   :  { %v160_v41 = vpop.xlane.xlu0 %159 }
  0xa1   :  { %v743_v29 = vmul.f32 0.0078125, %v160_v41 }
  0xa3   :  { %v713_v42 = vpop.xlane.xlu1 %168 }
  0xa4   :  { %v166_v43 = vpop.xlane.xlu0 %165 }
  0xa7   :  { %v715_v44 = vpop.xlane.xlu1 %174 }
  0xa8   :  { %v172_v48 = vpop.xlane.xlu0 %171 }
  0xab   :  { %v194_v49 = vpop.xlane.xlu1 %193 }
  0xac   :  { %v231_v53 = vmul.f32 0.0078125, %v194_v49  ;;  %v723_v55 = vpop.xlane.xlu0 %177  ;;  %v247_v49 = vmul.f32 %v731_v10, %v731_v10 }
  0xae   :  { %v257_v57 = vsub.f32 %v231_v53, %v244_v54  ;;  %v310_v54 = vsub.f32 %v472_v13, %v725_v56 }
  0xaf   :  { %v200_v61 = vpop.xlane.xlu1 %199 }
  0xb0   :  { %v270_v62 = vmax.f32 %v257_v57, 0.0  ;;  %v233_v4 = vmul.f32 0.0078125, %v200_v61  ;;  %v197_v6 = vpop.xlane.xlu0 %196  ;;  %v753_v61 = vmul.f32 0.0078125, %v163_v40  ;;  %v323_v40 = vsub.f32 %v477_v14, %v725_v56 }
  0xb1   :  { %v232_v12 = vmul.f32 0.0078125, %v197_v6  ;;  %v312_v56 = vsub.f32 %v456_v7, %v731_v10 }
  0xb2   :  { %v283_v17 = vadd.f32 1e-05, %v270_v62  ;;  %v259_v18 = vsub.f32 %v233_v4, %v246_v63  ;;  %v755_v62 = vmul.f32 0.0078125, %v166_v43  ;;  %v313_v43 = vsub.f32 %v496_v21, %v727_v58 }
  0xb3   :  { %v258_v24 = vsub.f32 %v232_v12, %v245_v11  ;;  %v206_v25 = vpop.xlane.xlu1 %205  ;;  %v250_v12 = vmul.f32 %v743_v29, %v743_v29 }
  0xb4   :  { %391 = vrsqrt.f32 %v283_v17  ;;  %v272_v30 = vmax.f32 %v259_v18, 0.0  ;;  %v235_v33 = vmul.f32 0.0078125, %v206_v25  ;;  %v203_v34 = vpop.xlane.xlu0 %202 }
  0xb5   :  { %v271_v39 = vmax.f32 %v258_v24, 0.0  ;;  %v234_v53 = vmul.f32 0.0078125, %v203_v34  ;;  %v252_v34 = vmul.f32 %v755_v62, %v755_v62 }
  0xb6   :  { %v285_v57 = vadd.f32 1e-05, %v272_v30  ;;  %v261_v41 = vsub.f32 %v235_v33, %v248_v26 }
  0xb7   :  { %v284_v63 = vadd.f32 1e-05, %v271_v39  ;;  %v260_v38 = vsub.f32 %v234_v53, %v247_v49  ;;  %v212_v4 = vpop.xlane.xlu1 %211  ;;  %v251_v39 = vmul.f32 %v753_v61, %v753_v61  ;;  %v769_v49 = vmul.f32 0.0078125, %v172_v48 }
  0xb8   :  { %393 = vrsqrt.f32 %v285_v57  ;;  %v274_v6 = vmax.f32 %v261_v41, 0.0  ;;  %v237_v11 = vmul.f32 0.0078125, %v212_v4  ;;  %v209_v17 = vpop.xlane.xlu0 %208  ;;  %v772_v41 = vmul.f32 0.0078125, %v713_v42 }
  0xb9   :  { %395 = vrsqrt.f32 %v284_v63  ;;  %v273_v5 = vmax.f32 %v260_v38, 0.0  ;;  %v236_v18 = vmul.f32 0.0078125, %v209_v17 }
  0xba   :  { %v287_v24 = vadd.f32 1e-05, %v274_v6  ;;  %v263_v25 = vsub.f32 %v237_v11, %v250_v12  ;;  %v326_v6 = vsub.f32 %v501_v22, %v727_v58  ;;  %v777_v11 = vmul.f32 0.0078125, %v723_v55 }
  0xbb   :  { %v286_v26 = vadd.f32 1e-05, %v273_v5  ;;  %v262_v30 = vsub.f32 %v236_v18, %v249_v45  ;;  %v218_v33 = vpop.xlane.xlu1 %217  ;;  %v253_v55 = vmul.f32 %v772_v41, %v772_v41 }
  0xbc   :  { %397 = vrsqrt.f32 %v287_v24  ;;  %v276_v53 = vmax.f32 %v263_v25, 0.0  ;;  %v239_v57 = vmul.f32 0.0078125, %v218_v33  ;;  %v215_v14 = vpop.xlane.xlu0 %214  ;;  %v792_v33 = vmul.f32 0.0078125, %v715_v44 }
  0xbd   :  { %399 = vrsqrt.f32 %v286_v26  ;;  %v275_v63 = vmax.f32 %v262_v30, 0.0  ;;  %v238_v38 = vmul.f32 0.0078125, %v215_v14  ;;  %v254_v26 = vmul.f32 %v769_v49, %v769_v49 }
  0xbe   :  { %v392_v4 = vpop.eup %391  ;;  %v289_v12 = vadd.f32 1e-05, %v276_v53  ;;  %v265_v48 = vsub.f32 %v239_v57, %v252_v34  ;;  %v256_v53 = vmul.f32 %v777_v11, %v777_v11 }
  0xbf   :  { %v335_v17 = vmul.f32 %v392_v4, %v309_v23  ;;  %v348_v5 = vmul.f32 %v392_v4, %v322_v2  ;;  %v288_v45 = vadd.f32 1e-05, %v275_v63  ;;  %v264_v18 = vsub.f32 %v238_v38, %v251_v39  ;;  %v224_v24 = vpop.xlane.xlu1 %223 }
  0xc0   :  { %401 = vrsqrt.f32 %v289_v12  ;;  %v278_v42 = vmax.f32 %v265_v48, 0.0  ;;  %v241_v25 = vmul.f32 0.0078125, %v224_v24  ;;  %v221_v30 = vpop.xlane.xlu0 %220 }
  0xc1   :  { %361 = vst.msk [vmem:[%s943_s1] sm:$0xff] %vm34_vm0, %v335_v17  ;;  %374 = vst.msk [vmem:[%s943_s1 + $0x68] sm:$0xff] %vm34_vm0, %v348_v5  ;;  %403 = vrsqrt.f32 %v288_v45  ;;  %v277_v22 = vmax.f32 %v264_v18, 0.0  ;;  %v240_v23 = vmul.f32 0.0078125, %v221_v30 }
  0xc2   :  { %v394_v2 = vpop.eup %393  ;;  %v291_v34 = vadd.f32 1e-05, %v278_v42  ;;  %v267_v39 = vsub.f32 %v241_v25, %v254_v26  ;;  %v315_v25 = vsub.f32 %v524_v31, %v743_v29  ;;  %v328_v26 = vsub.f32 %v529_v32, %v743_v29 }
  0xc3   :  { %v396_v57 = vpop.eup %395  ;;  %v337_v14 = vmul.f32 %v394_v2, %v311_v16  ;;  %v350_v63 = vmul.f32 %v394_v2, %v324_v19  ;;  %v290_v38 = vadd.f32 1e-05, %v277_v22  ;;  %v266_v4 = vsub.f32 %v240_v23, %v253_v55  ;;  %v230_v12 = vpop.xlane.xlu1 %229 }
  0xc4   :  { %v336_v44 = vmul.f32 %v396_v57, %v310_v54  ;;  %v349_v48 = vmul.f32 %v396_v57, %v323_v40  ;;  %405 = vrsqrt.f32 %v291_v34  ;;  %v280_v17 = vmax.f32 %v267_v39, 0.0  ;;  %v227_v5 = vpop.xlane.xlu0 %226 }
  0xc5   :  { %363 = vst.msk [vmem:[%s943_s1 + $0x10] sm:$0xff] %vm34_vm0, %v337_v14  ;;  %376 = vst.msk [vmem:[%s943_s1 + $0x78] sm:$0xff] %vm34_vm0, %v350_v63  ;;  %407 = vrsqrt.f32 %v290_v38  ;;  %v279_v0 = vmax.f32 %v266_v4, 0.0  ;;  %v243_v1 = vmul.f32 0.0078125, %v230_v12  ;;  %v242_v52 = vmul.f32 0.0078125, %v227_v5 }
  0xc6   :  { %v398_v13 = vpop.eup %397  ;;  %v325_v16 = vsub.f32 %v461_v8, %v731_v10  ;;  %362 = vst.msk [vmem:[%s943_s1 + $0x8] sm:$0xff] %vm34_vm0, %v336_v44  ;;  %375 = vst.msk [vmem:[%s943_s1 + $0x70] sm:$0xff] %vm34_vm0, %v349_v48  ;;  %v293_v19 = vadd.f32 1e-05, %v280_v17  ;;  %v255_v54 = vmul.f32 %v792_v33, %v792_v33  ;;  %v327_v31 = vsub.f32 %v491_v20, %v745_v35 }
  0xc7   :  { %v400_v40 = vpop.eup %399  ;;  %v339_v7 = vmul.f32 %v398_v13, %v313_v43  ;;  %v352_v8 = vmul.f32 %v398_v13, %v326_v6  ;;  %v292_v10 = vadd.f32 1e-05, %v279_v0  ;;  %v269_v45 = vsub.f32 %v243_v1, %v256_v53 }
  0xc8   :  { %v338_v18 = vmul.f32 %v400_v40, %v312_v56  ;;  %v351_v24 = vmul.f32 %v400_v40, %v325_v16  ;;  %409 = vrsqrt.f32 %v293_v19  ;;  %v268_v42 = vsub.f32 %v242_v52, %v255_v54 }
  0xc9   :  { %365 = vst.msk [vmem:[%s943_s1 + $0x20] sm:$0xff] %vm34_vm0, %v339_v7  ;;  %378 = vst.msk [vmem:[%s943_s1 + $0x88] sm:$0xff] %vm34_vm0, %v352_v8  ;;  %411 = vrsqrt.f32 %v292_v10  ;;  %v282_v21 = vmax.f32 %v269_v45, 0.0  ;;  %v314_v43 = vsub.f32 %v482_v15, %v745_v35  ;;  %v317_v20 = vsub.f32 %v560_v46, %v755_v62 }
  0xca   :  { %v402_v58 = vpop.eup %401  ;;  %364 = vst.msk [vmem:[%s943_s1 + $0x18] sm:$0xff] %vm34_vm0, %v338_v18  ;;  %377 = vst.msk [vmem:[%s943_s1 + $0x80] sm:$0xff] %vm34_vm0, %v351_v24  ;;  %v281_v32 = vmax.f32 %v268_v42, 0.0  ;;  %v330_v35 = vsub.f32 %v565_v47, %v755_v62  ;;  %v316_v34 = vsub.f32 %v511_v27, %v753_v61  ;;  %v329_v46 = vsub.f32 %v516_v28, %v753_v61 }
  0xcb   :  { %v404_v29 = vpop.eup %403  ;;  %v341_v6 = vmul.f32 %v402_v58, %v315_v25  ;;  %v354_v30 = vmul.f32 %v402_v58, %v328_v26  ;;  %v295_v22 = vadd.f32 1e-05, %v282_v21  ;;  %v319_v27 = vsub.f32 %v590_v59, %v769_v49 }
  0xcc   :  { %v340_v55 = vmul.f32 %v404_v29, %v314_v43  ;;  %v353_v15 = vmul.f32 %v404_v29, %v327_v31  ;;  %v294_v23 = vadd.f32 1e-05, %v281_v32  ;;  %v332_v28 = vsub.f32 %v595_v60, %v769_v49 }
  0xcd   :  { %367 = vst.msk [vmem:[%s943_s1 + $0x30] sm:$0xff] %vm34_vm0, %v341_v6  ;;  %380 = vst.msk [vmem:[%s943_s1 + $0x98] sm:$0xff] %vm34_vm0, %v354_v30  ;;  %413 = vrsqrt.f32 %v295_v22  ;;  %v318_v14 = vsub.f32 %v537_v36, %v772_v41  ;;  %v331_v59 = vsub.f32 %v542_v37, %v772_v41  ;;  %v321_v36 = vsub.f32 %v605_v3, %v777_v11 }
  0xce   :  { %v406_v2 = vpop.eup %405  ;;  %366 = vst.msk [vmem:[%s943_s1 + $0x28] sm:$0xff] %vm34_vm0, %v340_v55  ;;  %379 = vst.msk [vmem:[%s943_s1 + $0x90] sm:$0xff] %vm34_vm0, %v353_v15  ;;  %415 = vrsqrt.f32 %v294_v23  ;;  %v334_v37 = vsub.f32 %v611_v9, %v777_v11  ;;  %v320_v12 = vsub.f32 %v571_v50, %v792_v33  ;;  %v333_v3 = vsub.f32 %v576_v51, %v792_v33 }
  0xcf   :  { %v408_v47 = vpop.eup %407  ;;  %v343_v62 = vmul.f32 %v406_v2, %v317_v20  ;;  %v356_v39 = vmul.f32 %v406_v2, %v330_v35 }
  0xd0   :  { %v342_v53 = vmul.f32 %v408_v47, %v316_v34  ;;  %v355_v57 = vmul.f32 %v408_v47, %v329_v46 }
  0xd1   :  { %369 = vst.msk [vmem:[%s943_s1 + $0x40] sm:$0xff] %vm34_vm0, %v343_v62  ;;  %382 = vst.msk [vmem:[%s943_s1 + $0xa8] sm:$0xff] %vm34_vm0, %v356_v39 }
  0xd2   :  { %v410_v61 = vpop.eup %409  ;;  %368 = vst.msk [vmem:[%s943_s1 + $0x38] sm:$0xff] %vm34_vm0, %v342_v53  ;;  %381 = vst.msk [vmem:[%s943_s1 + $0xa0] sm:$0xff] %vm34_vm0, %v355_v57 }
  0xd3   :  { %v412_v60 = vpop.eup %411  ;;  %v345_v49 = vmul.f32 %v410_v61, %v319_v27  ;;  %v358_v63 = vmul.f32 %v410_v61, %v332_v28 }
  0xd4   :  { %v344_v38 = vmul.f32 %v412_v60, %v318_v14  ;;  %v357_v4 = vmul.f32 %v412_v60, %v331_v59 }
  0xd5   :  { %371 = vst.msk [vmem:[%s943_s1 + $0x50] sm:$0xff] %vm34_vm0, %v345_v49  ;;  %384 = vst.msk [vmem:[%s943_s1 + $0xb8] sm:$0xff] %vm34_vm0, %v358_v63 }
  0xd6   :  { %370 = vst.msk [vmem:[%s943_s1 + $0x48] sm:$0xff] %vm34_vm0, %v344_v38  ;;  %383 = vst.msk [vmem:[%s943_s1 + $0xb0] sm:$0xff] %vm34_vm0, %v357_v4 }
  0xd7   :  { %v414_v41 = vpop.eup %413 }
  0xd8   :  { %v416_v44 = vpop.eup %415  ;;  %v347_v48 = vmul.f32 %v414_v41, %v321_v36  ;;  %v360_v9 = vmul.f32 %v414_v41, %v334_v37 }
  0xd9   :  { %v346_v11 = vmul.f32 %v416_v44, %v320_v12  ;;  %v359_v17 = vmul.f32 %v416_v44, %v333_v3 }
  0xda   :  { %373 = vst.msk [vmem:[%s943_s1 + $0x60] sm:$0xf] %vm71_vm1, %v347_v48  ;;  %386 = vst.msk [vmem:[%s943_s1 + $0xc8] sm:$0xf] %vm71_vm1, %v360_v9 }
  0xdb   :  { %372 = vst.msk [vmem:[%s943_s1 + $0x58] sm:$0xff] %vm34_vm0, %v346_v11  ;;  %385 = vst.msk [vmem:[%s943_s1 + $0xc0] sm:$0xff] %vm34_vm0, %v359_v17 }

</bundles_post_ra>
